<compile_context>
chip_gen: v7x
topology: tpu7x:2x2x1
jax: 0.10.0
libtpu: 0.0.40
codegen_flags: <defaults>
</compile_context>

<pallas_src>
import math

import jax
import jax.numpy as jnp
from jax.experimental import pallas as pl
from jax.experimental.pallas import tpu as pltpu


def _pos_embed_kernel(s_ref, w_ref, out_ref):
    """out = S @ W.

    S: (P+1, 2G+1) fused selection matrix (row 0 -> CLS slot, row 1+p -> the
       two slots {p // G, G + p % G}).
    W: (2G+1, H) = [[pos_h | 0], [0 | pos_w], [cls]].
    The single dot fuses both gathers, the hidden-axis concat and the CLS row;
    the result is written as one aligned full-block store.
    """
    out_ref[...] = jnp.dot(
        s_ref[...], w_ref[...], preferred_element_type=jnp.float32
    ).astype(out_ref.dtype)


@jax.jit
def learned_2d_positional_embedding(pos_embed_h, pos_embed_w, cls_pos_embedding):
    """pos_embed_h/w: (1, G, H//2); cls_pos_embedding: (1, 1, H).

    Returns pos_embed of shape (1, G*G + 1, H) — identical semantics to the
    PyTorch module's forward.  The forward never reads x's values (only its
    shape), so x is not passed to the kernel; compute this once and reuse it.
    """
    _, grid_size, half = pos_embed_h.shape
    hidden = cls_pos_embedding.shape[-1]
    assert 2 * half == hidden
    num_patches = grid_size * grid_size
    dtype = cls_pos_embedding.dtype

    # ---- one-time, parameter-only glue (constant-sized, jit-cached) ----
    # Fused selection matrix S: exact 0/1 values, so the matmul is bit-exact.
    n_sel = 2 * grid_size + 1
    patch = jnp.arange(num_patches)
    s_hw = (jax.nn.one_hot(patch // grid_size, n_sel, dtype=dtype)
            + jax.nn.one_hot(grid_size + patch % grid_size, n_sel, dtype=dtype))
    s_cls = jax.nn.one_hot(jnp.array([n_sel - 1]), n_sel, dtype=dtype)
    sel = jnp.concatenate([s_cls, s_hw], axis=0)              # (P+1, 2G+1)

    # Weight table W = [[pos_h | 0], [0 | pos_w], [cls]].
    zeros = jnp.zeros((grid_size, half), dtype)
    w = jnp.concatenate(
        [jnp.concatenate([pos_embed_h[0], zeros], axis=-1),   # (G, H)
         jnp.concatenate([zeros, pos_embed_w[0]], axis=-1),   # (G, H)
         cls_pos_embedding[0]],                               # (1, H)
        axis=0)                                               # (2G+1, H)

    # Grid-less pallas_call: whole arrays resident in VMEM, single kernel
    # invocation, no pipeline/double-buffer overhead.
    out = pl.pallas_call(
        _pos_embed_kernel,
        out_shape=jax.ShapeDtypeStruct((num_patches + 1, hidden), dtype),
        in_specs=[pl.BlockSpec(memory_space=pltpu.MemorySpace.VMEM),
                  pl.BlockSpec(memory_space=pltpu.MemorySpace.VMEM)],
        out_specs=pl.BlockSpec(memory_space=pltpu.MemorySpace.VMEM),
    )(sel, w)

    return out[None, :, :]   # (1, P + 1, H)


def _trunc_normal(key, shape, std, dtype=jnp.float32):
    # Mimic nn.init.trunc_normal_(mean=0, std=std, a=-2, b=2).
    lo = -2.0 / std
    hi = 2.0 / std
    return (jax.random.truncated_normal(key, lo, hi, shape, dtype) * std).astype(dtype)


if __name__ == "__main__":
    # config: image_size=16, patch_size=4 -> num_patches=16, grid_size=4, hidden=32
    hidden_size = 32
    image_size = 16
    patch_size = 4
    initializer_range = 0.02
    num_patches = (image_size // patch_size) ** 2
    grid_size = int(math.sqrt(num_patches))
    batch = 2
    seq_len = num_patches + 1  # includes CLS token

    root = jax.random.PRNGKey(0)
    k_h, k_w, k_cls, k_x = jax.random.split(root, 4)

    pos_embed_h = _trunc_normal(k_h, (1, grid_size, hidden_size // 2), initializer_range)
    pos_embed_w = _trunc_normal(k_w, (1, grid_size, hidden_size // 2), initializer_range)
    cls_pos_embedding = _trunc_normal(k_cls, (1, 1, hidden_size), initializer_range)

    # x is only used for its shape in the PyTorch forward (values never read).
    x = jax.random.normal(k_x, (batch, seq_len, hidden_size), dtype=jnp.float32)

    pos_embed = learned_2d_positional_embedding(
        pos_embed_h, pos_embed_w, cls_pos_embedding)
    pos_embed = jax.block_until_ready(pos_embed)

    # Pure-JAX reference (same math as the PyTorch forward).
    h_pos = jnp.broadcast_to(pos_embed_h[:, :, None, :],
                             (1, grid_size, grid_size, hidden_size // 2))
    w_pos = jnp.broadcast_to(pos_embed_w[:, None, :, :],
                             (1, grid_size, grid_size, hidden_size // 2))
    hw_pos = jnp.concatenate([h_pos, w_pos], axis=-1).reshape(1, num_patches, hidden_size)
    ref = jnp.concatenate([cls_pos_embedding, hw_pos], axis=1)

    assert pos_embed.shape == (1, seq_len, hidden_size), pos_embed.shape
    assert pos_embed.shape[1] == x.shape[1]
    assert jnp.allclose(pos_embed, ref, atol=1e-6), "mismatch vs reference"
    print("KERNEL_OK")
</pallas_src>

<mosaic_0001>
module attributes {stable_mosaic.version = 11 : i64} {
  func.func @_pos_embed_kernel(%arg0: memref<17x9xf32, #tpu.memory_space<vmem>>, %arg1: memref<9x32xf32, #tpu.memory_space<vmem>>, %arg2: memref<17x32xf32, #tpu.memory_space<vmem>>) attributes {dimension_semantics = [], scalar_prefetch = 0 : i64, scratch_operands = 0 : i64, tpu.core_type = #tpu.core_type<tc>} {
    %c0 = arith.constant 0 : index
    %c0_0 = arith.constant 0 : index
    %0 = vector.load %arg0[%c0, %c0_0] : memref<17x9xf32, #tpu.memory_space<vmem>>, vector<17x9xf32>
    %c0_1 = arith.constant 0 : index
    %c0_2 = arith.constant 0 : index
    %1 = vector.load %arg1[%c0_1, %c0_2] : memref<9x32xf32, #tpu.memory_space<vmem>>, vector<9x32xf32>
    %cst = arith.constant dense<0.000000e+00> : vector<17x32xf32>
    %2 = tpu.matmul %0, %1, %cst {dimension_numbers = #tpu.dot_dimension_numbers<[1], [0], [0], [1], [0, 0, 1, 1], [], []>} : vector<17x9xf32>, vector<9x32xf32>, vector<17x32xf32> -> vector<17x32xf32>
    %c0_3 = arith.constant 0 : index
    %c0_4 = arith.constant 0 : index
    %3 = vector.load %arg2[%c0_3, %c0_4] : memref<17x32xf32, #tpu.memory_space<vmem>>, vector<17x32xf32>
    tpu.vector_store %arg2[%c0_3, %c0_4], %2 {strides = array<i32>} : memref<17x32xf32, #tpu.memory_space<vmem>>, vector<17x32xf32>,
    return
  }
}

</mosaic_0001>

<bundles_post_ra>
// kernel: learned_2d_positional_embedding.1
= control target key start
LH: loop header
LB: loop body
LE: loop exit
PB: predicated region body
PF: predicated region fallthrough
CT: control target
= control target key end

     0   :  { %vm26_vm0 = vcmask 1040384   ;;  %v151_v0 = vmov 0.0|0.0   ;;  %vm152_vm1 = vmmov 1   ;;  %vm153_vm3 = vmmov 0   ;;  %s194_s1 = inlined_call_operand.vmem [shape: f32[9,32], index: 1, kind: input, shape index: {}]   ;;  %s195_s0 = inlined_call_operand.vmem [shape: f32[17,9], index: 0, kind: input, shape index: {}]   ;;  %s196_s2 = inlined_call_operand.vmem [shape: f32[17,32], index: 2, kind: output, shape index: {}]  }
   0x1   :  { %145 = vmatprep.subr.bf16.mxu1 %v151_v0  ;;  %v14_v1 = vld [vmem:[%s194_s1] sm:$0xff]  ;;  %v15_v2 = vld [vmem:[%s194_s1 + $0x8] sm:$0x1]  ;;  %vm143_vm2 = vmpackc.low %vm26_vm0, %vm152_vm1  ;;  %141 = vmatprep.subr.bf16.mxu0 %v151_v0  ;;  %v154_v4 = vmov 0.0   ;;  %vm16_vm4 = vcmask 72704   ;;  %vm110_vm5 = vcmask 261120  }
   0x2   :  { %v142_v3 = vpack.c.bf16 %v15_v2, %v14_v1  ;;  %135 = vmatprep.mubr.msk.f32.mxu1 %vm153_vm3, %v154_v4  ;;  %132 = vmatprep.mubr.msk.f32.mxu0 %vm153_vm3, %v154_v4  ;;  %v12_v5 = vld [vmem:[%s195_s0 + $0x8] sm:$0xff]  ;;  %v11_v6 = vld [vmem:[%s195_s0] sm:$0xff]  ;;  %v13_v7 = vld [vmem:[%s195_s0 + $0x10] sm:$0x1]  ;;  %vm113_vm6 = vcmask 253952  }
   0x4   :  { %146 = vmatpush3.bf16.msk.msra.mxu1 %vm143_vm2, %v142_v3  ;;  %144 = vmatpush3.bf16.msk.msra.mxu0 %vm143_vm2, %v142_v3 }
   0x7   :  { %136 = vmatmul.mubr.msk.f32.vlgmr.msra.gmra.mrb[0].mxu1 %vm16_vm4, %v12_v5  ;;  %133 = vmatmul.mubr.msk.f32.vlgmr.msra.gmra.mrb[0].mxu0 %vm16_vm4, %v11_v6 }
   0x8   :  { %138 = vmatprep.mubr.msk.f32.mxu1 %vm153_vm3, %v154_v4 }
   0xb   :  { %139 = vmatmul.mubr.msk.f32.gmra.mrb[2].mxu1 %vm16_vm4, %v13_v7 }
  0xda   :  { %v101_v8 = vpop.f32.mrb[0].mxu1  ;;  %v96_v9 = vpop.f32.mrb[0].mxu0 }
  0xdb   :  { %112 = vst.msk [vmem:[%s196_s2 + $0x8] sm:$0xff] %vm110_vm5, %v101_v8  ;;  %v137_v10 = vpop.f32.mrb[1].mxu1  ;;  %111 = vst.msk [vmem:[%s196_s2] sm:$0xff] %vm110_vm5, %v96_v9  ;;  %v134_v11 = vpop.f32.mrb[1].mxu0 }
  0xde   :  { %v106_v12 = vpop.f32.mrb[2].mxu1 }
  0xdf   :  { %114 = vst.msk [vmem:[%s196_s2 + $0x10] sm:$0x1] %vm113_vm6, %v106_v12  ;;  %v140_v13 = vpop.f32.mrb[3].mxu1 }

</bundles_post_ra>
